<compile_context>
chip_gen: v7x
topology: tpu7x:2x2x1
jax: 0.10.0
libtpu: 0.0.40
codegen_flags: <defaults>
</compile_context>

<pallas_src>
import jax
import jax.numpy as jnp
from jax.experimental import pallas as pl
from jax.experimental.pallas import tpu as pltpu


# ----------------------------------------------------------------------------
# Kernel body
# ----------------------------------------------------------------------------
def _global_disc_kernel(x_ref, gf_ref, wl_ref, wg_ref, const_ref, out_ref):
    """Fused forward pass (all affine ops pre-folded in the wrapper).

    x_ref    : (TB, C*L)  raw local features, flattened, native dtype
    gf_ref   : (TB, G)    global features, native dtype
    wl_ref   : (1, C*L)   folded conv1*conv2*BN*dense_local weight (f32)
    wg_ref   : (1, G)     dense weight for the global part (f32)
    const_ref: (1,) SMEM  folded additive constant (BN shift + dense bias)
    out_ref  : (TB, 1)
    """
    # In-kernel cast: keeps HBM traffic in the narrow input dtype; the cast
    # rides idle VALU slots under the DMA (important on v5e: no bf16 VPU).
    x = x_ref[...].astype(jnp.float32)                 # (TB, C*L)
    gf = gf_ref[...].astype(jnp.float32)               # (TB, G)
    wl = wl_ref[...]                                   # (1, C*L)
    wg = wg_ref[...]                                   # (1, G)

    # VPU elementwise multiply + XLU lane reduce (no N=1 MXU matmuls).
    local = jnp.sum(x * wl, axis=-1, keepdims=True)    # (TB, 1)
    glob = jnp.sum(gf * wg, axis=-1, keepdims=True)    # (TB, 1)

    out_ref[...] = (local + glob + const_ref[0]).astype(out_ref.dtype)


# ----------------------------------------------------------------------------
# VMEM-budget / megacore-aware batch-tile picker
# ----------------------------------------------------------------------------
_VMEM_WORKING_SET_BUDGET = 24 * 1024 * 1024   # double-buffered tiles, safe on
_VMEM_LIMIT_BYTES = 32 * 1024 * 1024          # v5e / v6e / v7x scoped VMEM
_MAX_TB = 2048


def _round_up(x, m):
    return ((x + m - 1) // m) * m


def _pick_batch_tile(B, CL, G, x_itemsize, g_itemsize):
    """Pick the batch tile TB from the VMEM budget, not from divisibility.

    - Sublane granularity follows the narrowest activation dtype (8 rows for
      32-bit, 16 for 16-bit, 32 for 8-bit).
    - TB is the largest multiple of that granularity whose double-buffered
      working set fits the budget (capped at _MAX_TB).
    - TB is capped at ~B/2 (rounded up) so the grid has >=2 steps whenever
      possible and dimension_semantics=("parallel",) can shard the batch
      across v7x's two TensorCores.
    - Tiny batches (B <= granularity) use TB = B (block dim == full dim is
      always layout-legal).
    """
    min_itemsize = max(1, min(x_itemsize, g_itemsize))
    mult = max(8, 32 // min_itemsize)

    if B <= mult:
        return B, mult

    # Double-buffered per-row bytes: both inputs (+ f32 output row).
    row_bytes = 2 * (CL * x_itemsize + G * g_itemsize) + 2 * 4
    # Small fixed cost for the (double-buffered) folded weights.
    weight_bytes = 4 * (CL + G) * 4
    budget = max(_VMEM_WORKING_SET_BUDGET - weight_bytes, row_bytes * mult)

    tb = (budget // row_bytes) // mult * mult
    tb = max(tb, mult)
    tb = min(tb, _MAX_TB)
    # >=2 grid steps when possible -> both v7x TensorCores participate.
    tb = min(tb, _round_up(pl.cdiv(B, 2), mult))
    tb = min(tb, _round_up(B, mult))
    return max(tb, mult), mult


# ----------------------------------------------------------------------------
# One-time parameter folding (hoist out of the hot path)
# ----------------------------------------------------------------------------
def fold_global_disc_params(params, C, L, G):
    """Fold conv1 -> conv2 -> eval-BN -> dense_local into one weight over the
    raw (C, L) layout, plus the global dense slice and an additive constant.

    Call once per parameter set (or under jit so it constant-folds); the
    result is what `global_disc_eegnet` consumes every forward call.
    """
    f32 = jnp.float32
    L1 = (L - 3) // 2 + 1                               # Conv1d(k=3, s=2, VALID)

    # conv1 (16, C, 3) composed with conv2 (1, 16, 1) -> effective (C, 3)
    w1 = params["conv1_w"].astype(f32)                  # (16, C, 3)
    w2 = params["conv2_w"].astype(f32).reshape(16)      # (16,)
    w_eff = jnp.einsum("o,ock->ck", w2, w1)             # (C, 3)

    # eval-mode BatchNorm1d(1) with running statistics
    gamma = params["bn_gamma"][0].astype(f32)
    beta = params["bn_beta"][0].astype(f32)
    rmean = params["bn_rmean"][0].astype(f32)
    rvar = params["bn_rvar"][0].astype(f32)
    scale = gamma / jnp.sqrt(rvar + 1e-5)

    # dense weight split (local vs global part)
    wd = params["dense_w"].astype(f32).reshape(-1)      # (L1 + G,)
    assert wd.shape[0] == L1 + G, (
        f"dense1 expects {wd.shape[0]} features, got L1 + G = {L1 + G}")
    wl_t = wd[:L1]                                      # (L1,)
    wg = wd[L1:].reshape(1, G)                          # (1, G)

    # Fold conv * BN * dense_local into a weight over the RAW (C, L) layout:
    #   W_full[c, 2t+k] += scale * w_eff[c, k] * wl_t[t]   (no im2col)
    W_full = jnp.zeros((C, L), f32)
    for k in range(3):
        W_full = W_full.at[:, k:k + 2 * L1:2].add(
            scale * w_eff[:, k:k + 1] * wl_t[None, :])
    w_local = W_full.reshape(1, C * L)                  # (1, C*L)

    # Additive constant: BN shift through the local dense weights + dense bias.
    const = (beta - scale * rmean) * jnp.sum(wl_t) + params["dense_b"][0].astype(f32)
    const = jnp.asarray(const, f32).reshape(1)

    return {"w_local": w_local, "w_glob": wg, "const": const}


# ----------------------------------------------------------------------------
# Forward wrapper
# ----------------------------------------------------------------------------
def global_disc_eegnet(localf, globalf, folded):
    """Forward pass; `folded` comes from fold_global_disc_params (hoisted)."""
    B, C, L = localf.shape
    G = globalf.shape[1]
    CL = C * L
    assert folded["w_local"].shape == (1, CL)
    assert folded["w_glob"].shape == (1, G)

    # Keep activations in their native dtype through the DMA (no upcast here).
    x_flat = localf.reshape(B, CL)
    gf = globalf

    x_is = jnp.dtype(x_flat.dtype).itemsize
    g_is = jnp.dtype(gf.dtype).itemsize
    TB, _ = _pick_batch_tile(B, CL, G, x_is, g_is)
    grid = (pl.cdiv(B, TB),)

    cost = pl.CostEstimate(
        flops=2 * B * (CL + G),
        transcendentals=0,
        bytes_accessed=B * (CL * x_is + G * g_is) + B * 4 + (CL + G) * 4,
    )

    out = pl.pallas_call(
        _global_disc_kernel,
        out_shape=jax.ShapeDtypeStruct((B, 1), jnp.float32),
        grid=grid,
        in_specs=[
            pl.BlockSpec((TB, CL), lambda i: (i, 0)),
            pl.BlockSpec((TB, G), lambda i: (i, 0)),
            pl.BlockSpec((1, CL), lambda i: (0, 0)),
            pl.BlockSpec((1, G), lambda i: (0, 0)),
            pl.BlockSpec(memory_space=pltpu.MemorySpace.SMEM),
        ],
        out_specs=pl.BlockSpec((TB, 1), lambda i: (i, 0)),
        compiler_params=pltpu.CompilerParams(
            dimension_semantics=("parallel",),
            vmem_limit_bytes=_VMEM_LIMIT_BYTES,
        ),
        cost_estimate=cost,
    )(x_flat, gf, folded["w_local"], folded["w_glob"], folded["const"])
    return out


# ----------------------------------------------------------------------------
# Pure-JAX reference mirroring the PyTorch forward (eval mode)
# ----------------------------------------------------------------------------
def reference(localf, globalf, params):
    w1 = params["conv1_w"]
    w2 = params["conv2_w"]
    h = jax.lax.conv_general_dilated(localf, w1, window_strides=(2,),
                                     padding="VALID",
                                     dimension_numbers=("NCH", "OIH", "NCH"))
    h = jax.lax.conv_general_dilated(h, w2, window_strides=(1,),
                                     padding="VALID",
                                     dimension_numbers=("NCH", "OIH", "NCH"))
    gamma = params["bn_gamma"][0]
    beta = params["bn_beta"][0]
    rm = params["bn_rmean"][0]
    rv = params["bn_rvar"][0]
    h = (h - rm) / jnp.sqrt(rv + 1e-5) * gamma + beta
    h = h.reshape(localf.shape[0], -1)
    concat = jnp.concatenate([h, globalf], axis=-1)
    return concat @ params["dense_w"].T + params["dense_b"]


if __name__ == "__main__":
    key = jax.random.PRNGKey(0)
    ks = jax.random.split(key, 8)

    # Shapes chosen so flatten(local_conv(localf)) + globalf has 131 features:
    # L=200 -> L_out=99, nfeatg=32, 99+32=131 (matches nn.Linear(131, 1)).
    B, C, L, G = 2, 4, 200, 32
    localf = jax.random.normal(ks[0], (B, C, L), jnp.float32)
    globalf = jax.random.normal(ks[1], (B, G), jnp.float32)

    params = {
        "conv1_w": 0.1 * jax.random.normal(ks[2], (16, C, 3), jnp.float32),
        "conv2_w": 0.1 * jax.random.normal(ks[3], (1, 16, 1), jnp.float32),
        "bn_gamma": jnp.array([1.05], jnp.float32),
        "bn_beta": jnp.array([0.02], jnp.float32),
        "bn_rmean": jnp.array([0.10], jnp.float32),
        "bn_rvar": jnp.array([1.20], jnp.float32),
        "dense_w": 0.1 * jax.random.normal(ks[4], (1, 131), jnp.float32),
        "dense_b": 0.1 * jax.random.normal(ks[5], (1,), jnp.float32),
    }

    # One-time folding (hoisted out of the per-call path).
    folded = fold_global_disc_params(params, C, L, G)
    folded = jax.tree_util.tree_map(jax.block_until_ready, folded)

    out = global_disc_eegnet(localf, globalf, folded)
    out = jax.block_until_ready(out)

    ref = reference(localf, globalf, params)
    assert out.shape == (B, 1), out.shape
    assert jnp.allclose(out, ref, atol=1e-3, rtol=1e-3), (out, ref)
    print("KERNEL_OK")
</pallas_src>

<mosaic_0001>
module attributes {stable_mosaic.version = 11 : i64} {
  func.func @_global_disc_kernel(%arg0: i32, %arg1: memref<2x800xf32, #tpu.memory_space<vmem>>, %arg2: memref<2x32xf32, #tpu.memory_space<vmem>>, %arg3: memref<1x800xf32, #tpu.memory_space<vmem>>, %arg4: memref<1x32xf32, #tpu.memory_space<vmem>>, %arg5: memref<1xf32, #tpu.memory_space<smem>>, %arg6: memref<2x1xf32, #tpu.memory_space<vmem>>) attributes {dimension_semantics = [#tpu.dimension_semantics<parallel>], iteration_bounds = array<i64: 1>, scalar_prefetch = 0 : i64, scratch_operands = 0 : i64, tpu.core_type = #tpu.core_type<tc>, window_params = [{transform_indices = @transform_0, window_bounds = array<i64: 2, 800>}, {transform_indices = @transform_1, window_bounds = array<i64: 2, 32>}, {pipeline_mode = #tpu.pipeline_mode<synchronous>, transform_indices = @transform_2, window_bounds = array<i64: 1, 800>}, {pipeline_mode = #tpu.pipeline_mode<synchronous>, transform_indices = @transform_3, window_bounds = array<i64: 1, 32>}, {transform_indices = @transform_4, window_bounds = array<i64: 1>}, {transform_indices = @transform_5, window_bounds = array<i64: 2, 1>}]} {
    %c0 = arith.constant 0 : index
    %c0_0 = arith.constant 0 : index
    %0 = vector.load %arg1[%c0, %c0_0] : memref<2x800xf32, #tpu.memory_space<vmem>>, vector<2x800xf32>
    %c0_1 = arith.constant 0 : index
    %c0_2 = arith.constant 0 : index
    %1 = vector.load %arg2[%c0_1, %c0_2] : memref<2x32xf32, #tpu.memory_space<vmem>>, vector<2x32xf32>
    %c0_3 = arith.constant 0 : index
    %c0_4 = arith.constant 0 : index
    %2 = vector.load %arg3[%c0_3, %c0_4] : memref<1x800xf32, #tpu.memory_space<vmem>>, vector<1x800xf32>
    %c0_5 = arith.constant 0 : index
    %c0_6 = arith.constant 0 : index
    %3 = vector.load %arg4[%c0_5, %c0_6] : memref<1x32xf32, #tpu.memory_space<vmem>>, vector<1x32xf32>
    %4 = vector.broadcast %2 : vector<1x800xf32> to vector<2x800xf32>
    %5 = arith.mulf %0, %4 : vector<2x800xf32>
    %cst = arith.constant dense<0.000000e+00> : vector<2xf32>
    %6 = vector.multi_reduction <add>, %5, %cst [1] : vector<2x800xf32> to vector<2xf32>
    %7 = vector.shape_cast %6 : vector<2xf32> to vector<2x1xf32>
    %8 = vector.broadcast %3 : vector<1x32xf32> to vector<2x32xf32>
    %9 = arith.mulf %1, %8 : vector<2x32xf32>
    %cst_7 = arith.constant dense<0.000000e+00> : vector<2xf32>
    %10 = vector.multi_reduction <add>, %9, %cst_7 [1] : vector<2x32xf32> to vector<2xf32>
    %11 = vector.shape_cast %10 : vector<2xf32> to vector<2x1xf32>
    %12 = arith.addf %7, %11 : vector<2x1xf32>
    %c0_8 = arith.constant 0 : index
    %13 = memref.load %arg5[%c0_8] : memref<1xf32, #tpu.memory_space<smem>>
    %14 = vector.broadcast %13 : f32 to vector<2x1xf32>
    %15 = arith.addf %12, %14 : vector<2x1xf32>
    %c0_9 = arith.constant 0 : index
    %c0_10 = arith.constant 0 : index
    %16 = vector.load %arg6[%c0_9, %c0_10] : memref<2x1xf32, #tpu.memory_space<vmem>>, vector<2x1xf32>
    tpu.vector_store %arg6[%c0_9, %c0_10], %15 {strides = array<i32>} : memref<2x1xf32, #tpu.memory_space<vmem>>, vector<2x1xf32>,
    return
  }
  func.func @transform_0(%arg0: i32) -> (i32, i32) {
    %c0_i32 = arith.constant 0 : i32
    %c0_i32_0 = arith.constant 0 : i32
    return %arg0, %c0_i32 : i32, i32
  }
  func.func @transform_1(%arg0: i32) -> (i32, i32) {
    %c0_i32 = arith.constant 0 : i32
    %c0_i32_0 = arith.constant 0 : i32
    return %arg0, %c0_i32 : i32, i32
  }
  func.func @transform_2(%arg0: i32) -> (i32, i32) {
    %c0_i32 = arith.constant 0 : i32
    %c0_i32_0 = arith.constant 0 : i32
    %c0_i32_1 = arith.constant 0 : i32
    return %c0_i32, %c0_i32_0 : i32, i32
  }
  func.func @transform_3(%arg0: i32) -> (i32, i32) {
    %c0_i32 = arith.constant 0 : i32
    %c0_i32_0 = arith.constant 0 : i32
    %c0_i32_1 = arith.constant 0 : i32
    return %c0_i32, %c0_i32_0 : i32, i32
  }
  func.func @transform_4(%arg0: i32) -> i32 {
    %c0_i32 = arith.constant 0 : i32
    %c0_i32_0 = arith.constant 0 : i32
    return %c0_i32 : i32
  }
  func.func @transform_5(%arg0: i32) -> (i32, i32) {
    %c0_i32 = arith.constant 0 : i32
    %c0_i32_0 = arith.constant 0 : i32
    return %arg0, %c0_i32 : i32, i32
  }
}

</mosaic_0001>

<bundles_post_ra>
// kernel: tpu_custom_call.1
= control target key start
LH: loop header
LB: loop body
LE: loop exit
PB: predicated region body
PF: predicated region fallthrough
CT: control target
= control target key end

     0   :  { %11 = vsyncpa [#allocation4], 0  ;;  %s211_s18 = smov [#allocation3]   ;;  %s276_s0 = inlined_call_operand.hbm [shape: f32[2,800], index: 0, kind: input, shape index: {}]   ;;  %s277_s1 = inlined_call_operand.vmem [shape: f32[2,32], index: 1, kind: input, shape index: {}]   ;;  %s278_s2 = inlined_call_operand.vmem [shape: f32[1,800], index: 2, kind: input, shape index: {}]   ;;  %s279_s3 = inlined_call_operand.vmem [shape: f32[1,32], index: 3, kind: input, shape index: {}]   ;;  %s280_s4 = inlined_call_operand.<no memory space> [shape: f32[1], index: 4, kind: input, shape index: {}]   ;;  %s281_s5 = inlined_call_operand.vmem [shape: f32[2,1], index: 5, kind: output, shape index: {}]  }
   0x1   :  { %s18_s19 = sshll.u32 %s211_s18, 4  ;;  %s187_s22 = scalar_lea.hbm %s276_s0, 224  ;;  %s19_s19 = int_to_ptr.vmem [resolvable:$true] %s18_s19 }
   0x2   :  { %p188_p0 = scmp.ne.s32.totalorder %s276_s0, %s187_s22  ;;  %p191_p1 = scmp.lt.u32.totalorder %s187_s22, %s276_s0 }
   0x4   :  { %p193_p2 = pnand %p191_p1, %p188_p0 }
   0x6   :  { %196 = shalt.err (!%p193_p2)
}
   0x7   :  { %s197_s27 = scalar_lea.vmem %s19_s19, 224  ;;  %p202_p4 = scmp.lt.s32.totalorder %s19_s19, %s19_s19 }
   0x8   :  { %p198_p3 = scmp.ne.s32.totalorder %s19_s19, %s197_s27  ;;  %p203_p5 = scmp.lt.s32.totalorder %s197_s27, %s197_s27 }
   0xa   :  { %p204_p6 = por %p203_p5, %p202_p4 }
   0xc   :  { %p205_p7 = pnand %p204_p6, %p198_p3 }
   0xe   :  { %208 = shalt.err (!%p205_p7)
}
   0xf   :  { %21 = dma.hbm_to_vmem [thread:$0]  %s276_s0, 224, %s19_s19, [#allocation4]  }
  0x10   :  { %209 = dma.done.wait [#allocation4], 224  }
  0x11   :  { %210 = vsyncadd [#allocation4], 4294967072  ;;  %v39_v0 = vlaneseq  ;;  %v212_v1 = vmov 1983009808   ;;  %v36_v12 = vld [vmem:[%s278_s2] sm:$0x7f]  ;;  %v175_v61 = vstv %s280_s4 }
  0x12   :  { %v70_v2 = vunpack.c.l.s4 %v212_v1  ;;  %v33_v27 = vld [vmem:[#allocation3] sm:$0xff]  ;;  %v34_v29 = vld [vmem:[#allocation3 + $0x8] sm:$0x3f]  ;;  %vm146_vm0 = vcmask 1041408   ;;  %vm158_vm1 = vcmask 254976   ;;  %vm177_vm2 = vcmask 1024  }
  0x13   :  { %v40_v3 = vshrl.u32 %v39_v0, 7  ;;  %v35_v53 = vld [vmem:[%s277_s1] sm:$0x3] }
  0x14   :  { %v71_v4 = vunpack.c.0.s8 %v70_v2  ;;  %v184_v54 = vld [vmem:[%s279_s3] ss:$0 sm:$0xff] }
  0x15   :  { %v41_v5 = vsub.s32 0, %v40_v3  ;;  %v45_v6 = vsub.s32 1, %v40_v3  ;;  %v49_v7 = vsub.s32 2, %v40_v3  ;;  %v53_v8 = vsub.s32 3, %v40_v3 }
  0x16   :  { %v57_v9 = vsub.s32 4, %v40_v3  ;;  %v61_v10 = vsub.s32 5, %v40_v3  ;;  %v65_v11 = vsub.s32 6, %v40_v3  ;;  %v74_v13 = vsub.s32 %v71_v4, %v40_v3 }
  0x17   :  { %v42_v14 = vrot.slane %v36_v12, %v41_v5  ;;  %v46_v15 = vrot.slane %v36_v12, %v45_v6  ;;  %v50_v16 = vrot.slane %v36_v12, %v49_v7  ;;  %v54_v17 = vrot.slane %v36_v12, %v53_v8 }
  0x18   :  { %v58_v18 = vrot.slane %v36_v12, %v57_v9  ;;  %v62_v19 = vrot.slane %v36_v12, %v61_v10  ;;  %v66_v20 = vrot.slane %v36_v12, %v65_v11  ;;  %v169_v57 = vmul.f32 %v184_v54, %v35_v53 }
  0x19   :  { %v67_v21 = vcombine.low %v42_v14, %v46_v15  ;;  %v68_v22 = vcombine.low %v50_v16, %v54_v17 }
  0x1a   :  { %v84_v23 = vcombine.low %v58_v18, %v62_v19  ;;  %v98_v24 = vrot.slane %v66_v20, %v74_v13  ;;  %v170_v59 = vsel %vm158_vm1, %v169_v57, 0.0 }
  0x1b   :  { %v75_v25 = vrot.slane %v67_v21, %v74_v13  ;;  %v82_v26 = vrot.slane %v68_v22, %v74_v13 }
  0x1c   :  { %v91_v28 = vrot.slane %v84_v23, %v74_v13 }
  0x1d   :  { %v83_v30 = vcombine.low %v75_v25, %v82_v26 }
  0x1e   :  { %v99_v31 = vcombine.low %v91_v28, %v98_v24 }
  0x1f   :  { %v102_v32 = vmul.f32 %v83_v30, %v33_v27 }
  0x20   :  { %v103_v33 = vmul.f32 %v99_v31, %v34_v29 }
  0x21   :  { %v106_v34 = vcombine.high %v102_v32, %v102_v32  ;;  %v113_v35 = vrot.slane %v102_v32, %v74_v13 }
  0x22   :  { %v130_v38 = vrot.slane %v103_v33, %v74_v13  ;;  %v123_v41 = vcombine.high %v103_v33, %v103_v33 }
  0x23   :  { %v120_v36 = vrot.slane %v106_v34, %v74_v13  ;;  %v121_v37 = vcombine.high %v113_v35, %v113_v35  ;;  %v147_v39 = vsel %vm146_vm0, %v113_v35, 0.0 }
  0x24   :  { %v138_v45 = vcombine.high %v130_v38, %v130_v38  ;;  %v137_v48 = vrot.slane %v123_v41, %v74_v13  ;;  %v154_v49 = vsel %vm146_vm0, %v130_v38, 0.0 }
  0x25   :  { %v122_v40 = vcombine.high %v120_v36, %v120_v36  ;;  %v148_v42 = vsel %vm146_vm0, %v121_v37, 0.0  ;;  %v150_v43 = vsel %vm146_vm0, %v120_v36, 0.0 }
  0x26   :  { %v149_v44 = vadd.f32 %v148_v42, %v147_v39  ;;  %v156_v51 = vsel %vm146_vm0, %v138_v45, 0.0  ;;  %v159_v55 = vsel %vm158_vm1, %v137_v48, 0.0 }
  0x27   :  { %v152_v46 = vsel %vm146_vm0, %v122_v40, 0.0 }
  0x28   :  { %v151_v47 = vadd.f32 %v150_v43, %v149_v44 }
  0x2a   :  { %v153_v50 = vadd.f32 %v152_v46, %v151_v47 }
  0x2c   :  { %v155_v52 = vadd.f32 %v154_v49, %v153_v50 }
  0x2e   :  { %v157_v56 = vadd.f32 %v156_v51, %v155_v52 }
  0x30   :  { %v160_v58 = vadd.f32 %v159_v55, %v157_v56 }
  0x32   :  { %161 = vadd.xlane.f32.xlu0 %v160_v58 }
  0x36   :  { %171 = vadd.xlane.f32.xlu0 %v170_v59 }
  0xbf   :  { %v162_v60 = vpop.xlane.xlu0 %161 }
  0xc3   :  { %v172_v62 = vpop.xlane.xlu0 %171 }
  0xc4   :  { %v173_v63 = vadd.f32 %v172_v62, %v162_v60 }
  0xc6   :  { %v176_v0 = vadd.f32 %v175_v61, %v173_v63 }
  0xc8   :  { %178 = vst.msk [vmem:[%s281_s5] sm:$0x3] %vm177_vm2, %v176_v0 }
  0xc9   :  { %183 = vsyncpa [#allocation4], 1 }

</bundles_post_ra>
